<compile_context>
chip_gen: v7x
topology: tpu7x:2x2x1
jax: 0.10.0
libtpu: 0.0.40
codegen_flags: <defaults>
</compile_context>

<pallas_src>
import jax
import jax.numpy as jnp
from jax import lax
from jax.experimental import pallas as pl
from jax.experimental.pallas import tpu as pltpu


def _round_up(v, m):
    return ((v + m - 1) // m) * m


def _pad2(a, rows, cols, dtype):
    out = jnp.zeros((rows, cols), dtype)
    return out.at[: a.shape[0], : a.shape[1]].set(a.astype(dtype))


# ----------------------------------------------------------------------------
# Per-generation budgets / knobs
# ----------------------------------------------------------------------------
def _tpu_info():
    try:
        return pltpu.get_tpu_info()
    except Exception:
        return None


def _vmem_limit_bytes():
    # ~112 MiB on v5e/v6e (128 MiB physical), ~48 MiB on v7x (64 MiB physical).
    info = _tpu_info()
    if info is None:
        return 48 * 1024 * 1024
    return max(32 * 1024 * 1024, int(info.vmem_capacity_bytes) - 16 * 1024 * 1024)


def _is_v7x():
    info = _tpu_info()
    if info is None:
        return False
    return int(info.vmem_capacity_bytes) <= 80 * 1024 * 1024


def _adj_block_spec(tm, tk):
    idx = lambda i, k: (i, k)
    if _is_v7x():
        try:
            # deeper buffering to keep the dominant Â stream ahead of 3.2 TB/s HBM
            return pl.BlockSpec((tm, tk), idx, pipeline_mode=pl.Buffered(3))
        except Exception:
            pass
    return pl.BlockSpec((tm, tk), idx)


# ----------------------------------------------------------------------------
# Kernel 1: fused GCNConv layer
#   H = Â @ (X W) + b, then H <- relu(l2norm_rows(H))
#   Â streamed in (tm, tk) bf16 tiles (grid = rows-parallel x contraction-last),
#   X (=H_{l-1}) and W VMEM-resident, X@W recomputed per k-slab, f32 accumulator,
#   bias + L2-norm + ReLU fused into the k==last epilogue.
# ----------------------------------------------------------------------------
def conv_kernel(adj_ref, x_ref, w_ref, b_ref, out_ref, acc_ref):
    k = pl.program_id(1)

    @pl.when(k == 0)
    def _():
        acc_ref[...] = jnp.zeros_like(acc_ref)

    tk = adj_ref.shape[1]
    k0 = pl.multiple_of(k * tk, tk)
    # Recompute this k-slab of X@W (W resident): ~fin/tm extra MXU flops, zero extra
    # HBM traffic; saves the separate XW kernel and its HBM write/read.
    xw = jnp.dot(
        x_ref[pl.ds(k0, tk), :], w_ref[...], preferred_element_type=jnp.float32
    ).astype(jnp.bfloat16)
    acc_ref[...] += jnp.dot(adj_ref[...], xw, preferred_element_type=jnp.float32)

    @pl.when(k == pl.num_programs(1) - 1)
    def _():
        h = acc_ref[...] + b_ref[...]                       # f32 epilogue
        sumsq = jnp.sum(h * h, axis=1, keepdims=True)
        inv = lax.rsqrt(jnp.maximum(sumsq, 1e-24))          # == 1 / max(||h||, 1e-12)
        h = h * inv                                         # F.normalize(dim=1)
        out_ref[...] = jnp.maximum(h, 0.0).astype(out_ref.dtype)   # ReLU
        # NOTE: padded (all-zero) rows pick up the bias here; harmless because Â's
        # padded COLUMNS are zero and pooling masks exclude padded nodes.


def gcn_layer(adj, x, w, b, *, tm, tk, adj_spec, vmem_limit):
    n_pad = adj.shape[0]
    fp = x.shape[1]
    hp = w.shape[1]
    return pl.pallas_call(
        conv_kernel,
        out_shape=jax.ShapeDtypeStruct((n_pad, hp), jnp.bfloat16),
        grid_spec=pltpu.PrefetchScalarGridSpec(
            num_scalar_prefetch=0,
            grid=(n_pad // tm, n_pad // tk),                # reduction axis last
            in_specs=[
                adj_spec,                                   # streamed, dominant traffic
                pl.BlockSpec((n_pad, fp), lambda i, k: (0, 0)),   # H_{l-1}: VMEM-resident
                pl.BlockSpec((fp, hp), lambda i, k: (0, 0)),      # W: VMEM-resident
                pl.BlockSpec((1, hp), lambda i, k: (0, 0)),       # bias
            ],
            out_specs=pl.BlockSpec((tm, hp), lambda i, k: (i, 0)),
            scratch_shapes=[pltpu.VMEM((tm, hp), jnp.float32)],
        ),
        compiler_params=pltpu.CompilerParams(
            dimension_semantics=("parallel", "arbitrary"),
            vmem_limit_bytes=vmem_limit,
        ),
    )(adj, x, w, b)


# ----------------------------------------------------------------------------
# Kernel 2: global max / mean / sum pooling + final Linear in ONE call
#   starts/counts : (B,) int32 scalar-prefetch (contiguous batch row windows)
#   h             : (n_pad, hp) bf16 node embeddings (VMEM-resident)
#   mask          : (b_pad, n_pad) f32 one-hot graph assignment
#   wlin          : (3*hp, c_pad) f32 fused [max|mean|sum] Linear weight
#   bl            : (1, c_pad) f32
#   out           : (b_pad, c_pad) f32
# ----------------------------------------------------------------------------
def _make_pool_kernel(num_graphs, maxn, n_pad):
    def pool_lin_kernel(starts_ref, counts_ref, h_ref, mask_ref, wl_ref, bl_ref, out_ref):
        hp = h_ref.shape[1]
        b_pad = mask_ref.shape[0]
        hf = h_ref[...].astype(jnp.float32)                  # (n_pad, hp)
        mask = mask_ref[...]                                  # (b_pad, n_pad)

        # sum / mean for ALL graphs with a single full-rows MXU matmul
        sum_pool = jnp.dot(mask, hf, preferred_element_type=jnp.float32)   # (b_pad, hp)
        cnt = jnp.maximum(jnp.sum(mask, axis=1, keepdims=True), 1.0)
        mean_pool = sum_pool / cnt                            # exact division

        # per-graph max over a contiguous, scalar-prefetched row window
        rid = lax.broadcasted_iota(jnp.int32, (maxn, hp), 0)
        rows = []
        for g in range(num_graphs):   # TODO(synk): switch to fori_loop for very large B
            start = starts_ref[g]
            cnt_g = counts_ref[g]
            start_c = jnp.minimum(start, n_pad - maxn)        # keep static window in bounds
            off = start - start_c
            win = h_ref[pl.ds(start_c, maxn), :].astype(jnp.float32)
            valid = (rid >= off) & (rid < off + cnt_g)
            # h is post-ReLU (>= 0): masking excluded rows with 0 is exact.
            rows.append(jnp.max(jnp.where(valid, win, 0.0), axis=0, keepdims=True))
        if b_pad > num_graphs:
            rows.append(jnp.zeros((b_pad - num_graphs, hp), jnp.float32))
        max_pool = jnp.concatenate(rows, axis=0)              # (b_pad, hp)

        # one fused (b_pad, 3*hp) @ (3*hp, c_pad) output matmul
        feat = jnp.concatenate([max_pool, mean_pool, sum_pool], axis=1)
        out_ref[...] = jnp.dot(feat, wl_ref[...], preferred_element_type=jnp.float32) + bl_ref[...]

    return pool_lin_kernel


def pool_and_linear(starts, counts, h, mask, wlin, bl, *, maxn, vmem_limit):
    b_pad, n_pad = mask.shape
    hp = h.shape[1]
    c_pad = wlin.shape[1]
    num_graphs = starts.shape[0]
    kernel = _make_pool_kernel(num_graphs, maxn, n_pad)
    return pl.pallas_call(
        kernel,
        out_shape=jax.ShapeDtypeStruct((b_pad, c_pad), jnp.float32),
        grid_spec=pltpu.PrefetchScalarGridSpec(
            num_scalar_prefetch=2,
            grid=(1,),
            in_specs=[
                pl.BlockSpec((n_pad, hp), lambda i, s, c: (0, 0)),
                pl.BlockSpec((b_pad, n_pad), lambda i, s, c: (0, 0)),
                pl.BlockSpec((3 * hp, c_pad), lambda i, s, c: (0, 0)),
                pl.BlockSpec((1, c_pad), lambda i, s, c: (0, 0)),
            ],
            out_specs=pl.BlockSpec((b_pad, c_pad), lambda i, s, c: (0, 0)),
        ),
        compiler_params=pltpu.CompilerParams(
            dimension_semantics=("arbitrary",),
            vmem_limit_bytes=vmem_limit,
        ),
    )(starts, counts, h, mask, wlin, bl)


# ----------------------------------------------------------------------------
# Glue: dense normalized adjacency (add_self_loops=True, normalize=True), matching
# PyG gcn_norm:  Â[i, j] = deg^-1/2[i] * deg^-1/2[j]  for edge j -> i (and i == j),
# with deg counting the added self loop.  Zero-padded to n_pad and stored in bf16.
# ----------------------------------------------------------------------------
def build_norm_adj(edge_index, num_nodes, n_pad, dtype=jnp.bfloat16):
    src, dst = edge_index[0], edge_index[1]
    a = jnp.zeros((num_nodes, num_nodes), jnp.float32)
    a = a.at[dst, src].add(1.0)
    a = a + jnp.eye(num_nodes, dtype=jnp.float32)            # self loops
    deg = jnp.sum(a, axis=1)
    dinv = jnp.where(deg > 0, lax.rsqrt(deg), 0.0)
    a = dinv[:, None] * a * dinv[None, :]
    a = jnp.pad(a, ((0, n_pad - num_nodes), (0, n_pad - num_nodes)))
    return a.astype(dtype)


# ----------------------------------------------------------------------------
# Full GCN forward
# ----------------------------------------------------------------------------
def gcn_forward(params, x, edge_index, batch, num_graphs):
    n, fin = x.shape
    nh = params["convs"][0][0].shape[1]
    nc = params["lin_w"].shape[1]

    # n_pad >= 256 so the "parallel" row axis always has >= 2 tiles (v7x megacore)
    n_pad = max(256, _round_up(n, 128))
    fin_pad = _round_up(fin, 128)
    hp = _round_up(nh, 128)
    c_pad = _round_up(nc, 128)

    # largest Â tiles dividing n_pad (mem-bound: bigger tile -> closer to HBM roofline)
    tk = max(t for t in (512, 256, 128) if n_pad % t == 0)
    tm_cands = [t for t in (512, 256, 128) if n_pad % t == 0 and n_pad // t >= 2]
    tm = max(tm_cands) if tm_cands else 128

    vmem_limit = _vmem_limit_bytes()
    adj_spec = _adj_block_spec(tm, tk)

    adj = build_norm_adj(edge_index, n, n_pad)                # bf16 (n_pad, n_pad)
    h = _pad2(x, n_pad, fin_pad, jnp.bfloat16)

    # TODO(synk): H_{l-1} is kept fully VMEM-resident per layer (n_pad*128*2 B); for
    # graphs beyond ~10^5 nodes this should fall back to streamed tiles (gate on vmem_limit).
    for li, (w, b) in enumerate(params["convs"]):
        w_p = _pad2(w, fin_pad if li == 0 else hp, hp, jnp.bfloat16)
        b_p = _pad2(b, 1, hp, jnp.float32)
        h = gcn_layer(adj, h, w_p, b_p, tm=tm, tk=tk,
                      adj_spec=adj_spec, vmem_limit=vmem_limit)     # (n_pad, hp) bf16

    # ---- pooling + final Linear (single call) ----
    b_pad = _round_up(max(num_graphs, 1), 8)
    batch_p = jnp.pad(batch, (0, n_pad - n), constant_values=-1)    # padded nodes never match
    mask = (batch_p[None, :] == jnp.arange(b_pad)[:, None]).astype(jnp.float32)  # (b_pad, n_pad)

    # contiguous-batch row windows (PyG convention: nodes sorted by graph id)
    counts = jnp.sum(mask[:num_graphs], axis=1).astype(jnp.int32)
    starts = jnp.concatenate(
        [jnp.zeros((1,), jnp.int32), jnp.cumsum(counts)[:-1].astype(jnp.int32)])
    max_cnt = int(jnp.max(counts))            # TODO(synk): needs a static bound under jit
    maxn = min(n_pad, _round_up(max(max_cnt, 1), 8))

    # final Linear weight laid out as one (3*hp, c_pad) slab: [max | mean | sum] segments
    wl = params["lin_w"]                                            # (3*nh, nc)
    wlin = jnp.zeros((3 * hp, c_pad), jnp.float32)
    for s in range(3):
        wlin = wlin.at[s * hp: s * hp + nh, :nc].set(wl[s * nh:(s + 1) * nh].astype(jnp.float32))
    bl = _pad2(params["lin_b"], 1, c_pad, jnp.float32)

    out = pool_and_linear(starts, counts, h, mask, wlin, bl,
                          maxn=maxn, vmem_limit=vmem_limit)         # (b_pad, c_pad)
    return out[:num_graphs, :nc]


def init_params(key, n_feat, n_hidden, n_class, n_pool):
    keys = jax.random.split(key, 8)

    def lin_init(k, fan_in, fan_out):
        scale = 1.0 / jnp.sqrt(jnp.float32(fan_in))
        return jax.random.uniform(k, (fan_in, fan_out), jnp.float32, -scale, scale)

    convs = []
    dims = [(n_feat, n_hidden), (n_hidden, n_hidden), (n_hidden, n_hidden)]
    for i, (fi, fo) in enumerate(dims):
        w = lin_init(keys[i], fi, fo)
        b = jnp.zeros((1, fo), jnp.float32)        # GCNConv bias init to zeros
        convs.append((w, b))
    lin_in = n_hidden * n_pool
    lin_w = lin_init(keys[6], lin_in, n_class)
    lin_b = jax.random.uniform(
        keys[7], (1, n_class), jnp.float32,
        -1.0 / jnp.sqrt(jnp.float32(lin_in)), 1.0 / jnp.sqrt(jnp.float32(lin_in)))
    return {"convs": convs, "lin_w": lin_w, "lin_b": lin_b}


if __name__ == "__main__":
    n_feat, n_hidden, n_class = 8, 32, 4
    pooling = ["max", "mean", "sum"]
    N, B = 16, 2   # 16 nodes split across 2 graphs

    key = jax.random.PRNGKey(0)
    k_x, k_e, k_p = jax.random.split(key, 3)

    x = jax.random.normal(k_x, (N, n_feat), jnp.float32)

    # deterministic small graph: ring edges within each half, made symmetric
    src, dst = [], []
    for g in range(B):
        base = g * (N // B)
        n_g = N // B
        for i in range(n_g):
            a, b_ = base + i, base + (i + 1) % n_g
            src += [a, b_]
            dst += [b_, a]
    edge_index = jnp.array([src, dst], dtype=jnp.int32)
    batch = jnp.array([i // (N // B) for i in range(N)], dtype=jnp.int32)

    params = init_params(k_p, n_feat, n_hidden, n_class, len(pooling))

    out = gcn_forward(params, x, edge_index, batch, B)
    out = jax.block_until_ready(out)
    assert out.shape == (B, n_class)
    assert jnp.all(jnp.isfinite(out))
    print("KERNEL_OK")
</pallas_src>

<mosaic_0001>
module attributes {stable_mosaic.version = 11 : i64} {
  func.func @conv_kernel(%arg0: i32, %arg1: i32, %arg2: memref<128x256xbf16, #tpu.memory_space<vmem>>, %arg3: memref<256x128xbf16, #tpu.memory_space<vmem>>, %arg4: memref<128x128xbf16, #tpu.memory_space<vmem>>, %arg5: memref<1x128xf32, #tpu.memory_space<vmem>>, %arg6: memref<128x128xbf16, #tpu.memory_space<vmem>>, %arg7: memref<128x128xf32, #tpu.memory_space<vmem>>) attributes {dimension_semantics = [#tpu.dimension_semantics<parallel>, #tpu.dimension_semantics<arbitrary>], iteration_bounds = array<i64: 2, 1>, scalar_prefetch = 0 : i64, scratch_operands = 1 : i64, tpu.core_type = #tpu.core_type<tc>, window_params = [{transform_indices = @transform_0, window_bounds = array<i64: 128, 256>}, {pipeline_mode = #tpu.pipeline_mode<synchronous>, transform_indices = @transform_1, window_bounds = array<i64: 256, 128>}, {pipeline_mode = #tpu.pipeline_mode<synchronous>, transform_indices = @transform_2, window_bounds = array<i64: 128, 128>}, {pipeline_mode = #tpu.pipeline_mode<synchronous>, transform_indices = @transform_3, window_bounds = array<i64: 1, 128>}, {transform_indices = @transform_4, window_bounds = array<i64: 128, 128>}]} {
    %c0_i32 = arith.constant 0 : i32
    %0 = arith.cmpi eq, %arg1, %c0_i32 : i32
    %1 = arith.extui %0 : i1 to i32
    %c0_i32_0 = arith.constant 0 : i32
    %2 = arith.cmpi ne, %1, %c0_i32_0 : i32
    scf.if %2 {
      %cst_12 = arith.constant 0.000000e+00 : f32
      %18 = vector.broadcast %cst_12 : f32 to vector<128x128xf32>
      %c0_13 = arith.constant 0 : index
      %c0_14 = arith.constant 0 : index
      %19 = vector.load %arg7[%c0_13, %c0_14] : memref<128x128xf32, #tpu.memory_space<vmem>>, vector<128x128xf32>
      tpu.vector_store %arg7[%c0_13, %c0_14], %18 {strides = array<i32>} : memref<128x128xf32, #tpu.memory_space<vmem>>, vector<128x128xf32>,
    } else {
    }
    %c256_i32 = arith.constant 256 : i32
    %3 = arith.muli %arg1, %c256_i32 : i32
    %4 = tpu.assume_multiple %3, 256 : i32
    %5 = arith.index_cast %4 : i32 to index
    %c0 = arith.constant 0 : index
    %6 = vector.load %arg3[%5, %c0] : memref<256x128xbf16, #tpu.memory_space<vmem>>, vector<256x128xbf16>
    %c0_1 = arith.constant 0 : index
    %c0_2 = arith.constant 0 : index
    %7 = vector.load %arg4[%c0_1, %c0_2] : memref<128x128xbf16, #tpu.memory_space<vmem>>, vector<128x128xbf16>
    %cst = arith.constant dense<0.000000e+00> : vector<256x128xf32>
    %8 = tpu.matmul %6, %7, %cst {dimension_numbers = #tpu.dot_dimension_numbers<[1], [0], [0], [1], [0, 0, 1, 1], [], []>} : vector<256x128xbf16>, vector<128x128xbf16>, vector<256x128xf32> -> vector<256x128xf32>
    %9 = arith.truncf %8 : vector<256x128xf32> to vector<256x128xbf16>
    %c0_3 = arith.constant 0 : index
    %c0_4 = arith.constant 0 : index
    %10 = vector.load %arg7[%c0_3, %c0_4] : memref<128x128xf32, #tpu.memory_space<vmem>>, vector<128x128xf32>
    %c0_5 = arith.constant 0 : index
    %c0_6 = arith.constant 0 : index
    %11 = vector.load %arg2[%c0_5, %c0_6] : memref<128x256xbf16, #tpu.memory_space<vmem>>, vector<128x256xbf16>
    %cst_7 = arith.constant dense<0.000000e+00> : vector<128x128xf32>
    %12 = tpu.matmul %11, %9, %cst_7 {dimension_numbers = #tpu.dot_dimension_numbers<[1], [0], [0], [1], [0, 0, 1, 1], [], []>} : vector<128x256xbf16>, vector<256x128xbf16>, vector<128x128xf32> -> vector<128x128xf32>
    %13 = arith.addf %10, %12 : vector<128x128xf32>
    %c0_8 = arith.constant 0 : index
    %c0_9 = arith.constant 0 : index
    %14 = vector.load %arg7[%c0_8, %c0_9] : memref<128x128xf32, #tpu.memory_space<vmem>>, vector<128x128xf32>
    tpu.vector_store %arg7[%c0_8, %c0_9], %13 {strides = array<i32>} : memref<128x128xf32, #tpu.memory_space<vmem>>, vector<128x128xf32>,
    %c0_i32_10 = arith.constant 0 : i32
    %15 = arith.cmpi eq, %arg1, %c0_i32_10 : i32
    %16 = arith.extui %15 : i1 to i32
    %c0_i32_11 = arith.constant 0 : i32
    %17 = arith.cmpi ne, %16, %c0_i32_11 : i32
    scf.if %17 {
      %c0_12 = arith.constant 0 : index
      %c0_13 = arith.constant 0 : index
      %18 = vector.load %arg7[%c0_12, %c0_13] : memref<128x128xf32, #tpu.memory_space<vmem>>, vector<128x128xf32>
      %c0_14 = arith.constant 0 : index
      %c0_15 = arith.constant 0 : index
      %19 = vector.load %arg5[%c0_14, %c0_15] : memref<1x128xf32, #tpu.memory_space<vmem>>, vector<1x128xf32>
      %20 = vector.broadcast %19 : vector<1x128xf32> to vector<128x128xf32>
      %21 = arith.addf %18, %20 : vector<128x128xf32>
      %22 = arith.mulf %21, %21 : vector<128x128xf32>
      %cst_16 = arith.constant dense<0.000000e+00> : vector<128xf32>
      %23 = vector.multi_reduction <add>, %22, %cst_16 [1] : vector<128x128xf32> to vector<128xf32>
      %24 = vector.shape_cast %23 : vector<128xf32> to vector<128x1xf32>
      %cst_17 = arith.constant 1.000000e-24 : f32
      %25 = vector.broadcast %cst_17 : f32 to vector<128x1xf32>
      %26 = arith.maximumf %24, %25 : vector<128x1xf32>
      %27 = math.rsqrt %26 : vector<128x1xf32>
      %28 = vector.broadcast %27 : vector<128x1xf32> to vector<128x128xf32>
      %29 = arith.mulf %21, %28 : vector<128x128xf32>
      %cst_18 = arith.constant 0.000000e+00 : f32
      %30 = vector.broadcast %cst_18 : f32 to vector<128x128xf32>
      %31 = arith.maximumf %29, %30 : vector<128x128xf32>
      %32 = arith.truncf %31 : vector<128x128xf32> to vector<128x128xbf16>
      %c0_19 = arith.constant 0 : index
      %c0_20 = arith.constant 0 : index
      %33 = vector.load %arg6[%c0_19, %c0_20] : memref<128x128xbf16, #tpu.memory_space<vmem>>, vector<128x128xbf16>
      tpu.vector_store %arg6[%c0_19, %c0_20], %32 {strides = array<i32>} : memref<128x128xbf16, #tpu.memory_space<vmem>>, vector<128x128xbf16>,
    } else {
    }
    return
  }
  func.func @transform_0(%arg0: i32, %arg1: i32) -> (i32, i32) {
    %c0_i32 = arith.constant 0 : i32
    return %arg0, %arg1 : i32, i32
  }
  func.func @transform_1(%arg0: i32, %arg1: i32) -> (i32, i32) {
    %c0_i32 = arith.constant 0 : i32
    %c0_i32_0 = arith.constant 0 : i32
    %c0_i32_1 = arith.constant 0 : i32
    return %c0_i32, %c0_i32_0 : i32, i32
  }
  func.func @transform_2(%arg0: i32, %arg1: i32) -> (i32, i32) {
    %c0_i32 = arith.constant 0 : i32
    %c0_i32_0 = arith.constant 0 : i32
    %c0_i32_1 = arith.constant 0 : i32
    return %c0_i32, %c0_i32_0 : i32, i32
  }
  func.func @transform_3(%arg0: i32, %arg1: i32) -> (i32, i32) {
    %c0_i32 = arith.constant 0 : i32
    %c0_i32_0 = arith.constant 0 : i32
    %c0_i32_1 = arith.constant 0 : i32
    return %c0_i32, %c0_i32_0 : i32, i32
  }
  func.func @transform_4(%arg0: i32, %arg1: i32) -> (i32, i32) {
    %c0_i32 = arith.constant 0 : i32
    %c0_i32_0 = arith.constant 0 : i32
    return %arg0, %c0_i32 : i32, i32
  }
}

</mosaic_0001>

<bundles_post_ra>
// kernel: tpu_custom_call.1
= control target key start
LH: loop header
LB: loop body
LE: loop exit
PB: predicated region body
PF: predicated region fallthrough
CT: control target
= control target key end

     0   :  { %9 = vsyncpa [#allocation4], 0  ;;  %s2297_s0 = inlined_call_operand.hbm [shape: bf16[256,256], index: 0, kind: input, shape index: {}]   ;;  %s2298_s1 = inlined_call_operand.hbm [shape: bf16[256,128], index: 1, kind: input, shape index: {}]   ;;  %s2299_s2 = inlined_call_operand.hbm [shape: bf16[128,128], index: 2, kind: input, shape index: {}]   ;;  %s2300_s3 = inlined_call_operand.vmem [shape: f32[1,128], index: 3, kind: input, shape index: {}]   ;;  %s2301_s4 = inlined_call_operand.hbm [shape: bf16[256,128], index: 4, kind: output, shape index: {}]  }
   0x1   :  { %11 = vsyncpa [#allocation4 + $0x1], 0 }
   0x2   :  { %12 = vsyncpa [#allocation7], 0 }
   0x3   :  { %13 = vsyncpa [#allocation5], 0 }
   0x4   :  { %15 = vsyncpa [#allocation5 + $0x1], 0  ;;  %s1911_s15 = smov 0   ;;  %s1913_s16 = smov 0  }
   0x5   :  { %s1915_s17 = smov 0   ;;  %s1917_s18 = smov 0  }
   0x6   :  { %s1919_s19 = smov 0   ;;  %s1921_s20 = smov 0  }
   0x7 LB: > { %s1254_s21 = sadd.s32 4294967295, %s1874_s20   ;;  %s1255_s22 = sadd.s32 4294967294, %s1874_s20   ;;  %s1874_s20 = sphi %s1921_s20, %s21_s20   ;;  %s1870_s19 = sphi %s1919_s19, %s2323_s19   ;;  %s1866_s18 = sphi %s1917_s18, %s2322_s18   ;;  %s1862_s17 = sphi %s1915_s17, %s2321_s17   ;;  %s1858_s16 = sphi %s1913_s16, %s2320_s16   ;;  %s1854_s15 = sphi %s1911_s15, %s2319_s15  }
   0x8   : > { %p55_p0 = scmp.ne.s32.totalorder %s1858_s16, %s1854_s15  ;;  %p1945_p1 = scmp.eq.s32.totalorder %s1254_s21, 0 }
   0x9   : > { %p1949_p2 = scmp.eq.s32.totalorder %s1254_s21, 1  ;;  %p148_p3 = scmp.eq.s32.totalorder %s1255_s22, 1 }
   0xa   : > { %s2306_s23 = scalar_select %p1945_p1, 1, 0 }
   0xb   : > { %p1955_p4 = por %p1945_p1, %p55_p0  ;;  %p1256_p5 = scmp.ge.s32.totalorder %s1874_s20, 1 }
   0xc   : > { %p1960_p6 = por %p148_p3, %p55_p0  ;;  %p155_p7 = scmp.lt.s32.totalorder %s1874_s20, 3 }
   0xd   : > { %s2308_s25 = scalar_select %p1955_p4, 1, 0 }
   0xe   : > { %s2309_s26 = scalar_select %p1960_p6, 1, 0 }
   0xf   : > { %p1965_p8 = pnand %p1256_p5, %p155_p7  ;;  %s1876_s28 = smov [#allocation6]  }
  0x10   : > { %s167_s29 = sshll.u32 %s1876_s28, 4  ;;  %s1877_s5 = smov [#allocation8]   ;;  %s1969_s29 = int_to_ptr.vmem [resolvable:$true] %s167_s29 }
  0x11   : > { %p1545_p9 = pneg %p1965_p8  ;;  %s180_s6 = sshll.u32 %s1877_s5, 4  ;;  %s1980_s6 = int_to_ptr.vmem [resolvable:$true] %s180_s6 }
  0x12   : > { %s1702_s9 = scalar_lea.hbm %s2298_s1, 2048 }
  0x13   : > { %p1976_p11 = pnand %p1545_p9, %p1945_p1  ;;  %p1703_p12 = scmp.ne.s32.totalorder %s2298_s1, %s1702_s9 }
  0x14   : > { %p1709_p5 = scmp.lt.u32.totalorder %s1702_s9, %s2298_s1 }
  0x15   : > { %p1704_p13 = pneg %p1976_p11 }
  0x17   : > { %p1705_p0 = pnand %p1704_p13, %p1703_p12 }
  0x19   : > { %p1706_p3 = pneg %p1705_p0 }
  0x1b   : > { %p1711_p7 = pnand %p1709_p5, %p1706_p3 }
  0x1d   : > { %1714 = shalt.err (!%p1711_p7)
}
  0x1e   : > { %s1715_s14 = scalar_lea.vmem %s1969_s29, 2048  ;;  %p1723_p1 = scmp.lt.s32.totalorder %s1969_s29, %s1969_s29 }
  0x1f   : > { %p1716_p9 = scmp.ne.s32.totalorder %s1969_s29, %s1715_s14  ;;  %p1724_p12 = scmp.lt.s32.totalorder %s1715_s14, %s1715_s14 }
  0x21   : > { %p1718_p10 = pnand %p1716_p9, %p1704_p13  ;;  %p1725_p0 = por %p1724_p12, %p1723_p1 }
  0x23   : > { %p1719_p6 = pneg %p1718_p10 }
  0x25   : > { %p1726_p4 = pnand %p1725_p0, %p1719_p6 }
  0x27   : > { %1729 = shalt.err (!%p1726_p4)
}
  0x28   : > { %s1878_s21 = smov 64   ;;  %s1879_s22 = smov 4  }
  0x29   : > { %1548 = dma.hbm_to_vmem [thread:$0]  (!%p1976_p11), %s2298_s1, 2048, %s1969_s29, [#allocation7], %s1878_s21, %s1878_s21, %s1879_s22  }
  0x2a   : > { %s1730_s9 = scalar_lea.hbm %s2299_s2, 1024 }
  0x2b   : > { %p1731_p1 = scmp.ne.s32.totalorder %s2299_s2, %s1730_s9  ;;  %p1737_p10 = scmp.lt.u32.totalorder %s1730_s9, %s2299_s2 }
  0x2d   : > { %p1733_p4 = pnand %p1731_p1, %p1704_p13 }
  0x2f   : > { %p1734_p6 = pneg %p1733_p4 }
  0x31   : > { %p1739_p3 = pnand %p1737_p10, %p1734_p6 }
  0x33   : > { %1742 = shalt.err (!%p1739_p3)
}
  0x34   : > { %s1743_s29 = scalar_lea.vmem %s1980_s6, 1024  ;;  %p1751_p12 = scmp.lt.s32.totalorder %s1980_s6, %s1980_s6 }
  0x35   : > { %p1744_p5 = scmp.ne.s32.totalorder %s1980_s6, %s1743_s29  ;;  %p1752_p0 = scmp.lt.s32.totalorder %s1743_s29, %s1743_s29 }
  0x37   : > { %p1746_p7 = pnand %p1744_p5, %p1704_p13  ;;  %p1753_p1 = por %p1752_p0, %p1751_p12 }
  0x39   : > { %p1747_p9 = pneg %p1746_p7 }
  0x3b   : > { %p1754_p4 = pnand %p1753_p1, %p1747_p9 }
  0x3d   : > { %1757 = shalt.err (!%p1754_p4)
}
  0x3e   : > { %1551 = dma.hbm_to_vmem [thread:$0]  (!%p1976_p11), %s2299_s2, 1024, %s1980_s6, [#allocation7], %s1878_s21, %s1878_s21, %s1879_s22  }
  0x3f   : > { %s33_s5 = sadd.s32 1, %s1870_s19  ;;  %s42_s7 = sadd.s32 1, %s1862_s17 }
  0x40   : > { %p35_p13 = scmp.ge.s32.totalorder %s33_s5, 2  ;;  %p49_p6 = scmp.ne.s32.totalorder %s1862_s17, %s1858_s16 }
  0x41   : > { %p50_p10 = scmp.eq.s32.totalorder %s1874_s20, 0  ;;  %p1562_p3 = scmp.lt.s32.totalorder %s1874_s20, 2 }
  0x42   : > { %s2325_s5 = smov (%p35_p13, %s33_s5), 0  ;;  %p2044_p7 = por %p1949_p2, %p49_p6 }
  0x43   : > { %p51_p5 = por %p50_p10, %p49_p6  ;;  %s37_s8 = ssub.s32 %s1870_s19, %s2325_s5 }
  0x44   : > { %s2312_s30 = scalar_select %p2044_p7, 1, 0 }
  0x45   : > { %s197_s9 = sand.u32 1, %s1862_s17   ;;  %p40_p9 = scmp.eq.s32.totalorder %s37_s8, 0 }
  0x46   : > { %s1260_s6 = sshll.u32 %s197_s9, 7  ;;  %s1332_s21 = sshll.u32 %s1870_s19, 11 }
  0x47   : > { %s2053_s22 = scalar_select %p40_p9, %s1862_s17, %s42_s7  }
  0x48   : > { %s2058_s12 = scalar_lea.hbm %s2297_s0, %s1332_s21  ;;  %s201_s24 = scalar_lea.vmem [#allocation3], %s1260_s6 }
  0x49   : > { %s211_s13 = sshll.u32 %s201_s24, 4  ;;  %p2062_p2 = pnand %p1562_p3, %p51_p5  ;;  %s2066_s13 = int_to_ptr.vmem [resolvable:$true] %s211_s13 }
  0x4a   : > { %s2068_s14 = scalar_lea.sflag [#allocation4], %s197_s9  ;;  %s1758_s28 = scalar_lea.hbm %s2058_s12, 2048 }
  0x4b   : > { %p1759_p11 = scmp.ne.s32.totalorder %s2058_s12, %s1758_s28  ;;  %p1760_p12 = pneg %p2062_p2 }
  0x4c   : > { %s1763_s6 = scalar_lea.hbm %s2297_s0, 4096  ;;  %p1764_p4 = scmp.lt.u32.totalorder %s2058_s12, %s2297_s0 }
  0x4d   : > { %p1761_p0 = pnand %p1760_p12, %p1759_p11  ;;  %p1765_p13 = scmp.lt.u32.totalorder %s1763_s6, %s1758_s28 }
  0x4e   : > { %p1767_p10 = scmp.lt.u32.totalorder %s1758_s28, %s2058_s12 }
  0x4f   : > { %p1762_p1 = pneg %p1761_p0  ;;  %p1766_p6 = por %p1765_p13, %p1764_p4 }
  0x51   : > { %p1768_p3 = por %p1767_p10, %p1766_p6 }
  0x53   : > { %p1769_p5 = pnand %p1768_p3, %p1762_p1 }
  0x55   : > { %1772 = shalt.err (!%p1769_p5)
}
  0x56   : > { %s1773_s9 = scalar_lea.vmem %s2066_s13, 2048  ;;  %s1880_s11 = smov [#allocation3]  }
  0x57   : > { %p1774_p9 = scmp.ne.s32.totalorder %s2066_s13, %s1773_s9  ;;  %s1778_s24 = sshll.u32 %s1880_s11, 4  ;;  %s1779_s24 = int_to_ptr.vmem [resolvable:$false] %s1778_s24 }
  0x58   : > { %s1780_s7 = scalar_lea.vmem %s1779_s24, 4096  ;;  %p1781_p7 = scmp.lt.s32.totalorder %s2066_s13, %s1779_s24 }
  0x59   : > { %p1776_p11 = pnand %p1774_p9, %p1760_p12  ;;  %p1782_p4 = scmp.lt.s32.totalorder %s1780_s7, %s1773_s9 }
  0x5b   : > { %p1777_p0 = pneg %p1776_p11  ;;  %p1783_p13 = por %p1782_p4, %p1781_p7 }
  0x5d   : > { %p1784_p6 = pnand %p1783_p13, %p1777_p0 }
  0x5f   : > { %1787 = shalt.err (!%p1784_p6)
}
  0x60   : > { %s1881_s28 = smov 128   ;;  %s1882_s8 = smov 8  }
  0x61   : > { %1555 = dma.hbm_to_vmem [thread:$0]  (!%p2062_p2), %s2058_s12, 2048, %s2066_s13, %s2068_s14, %s1881_s28, %s1881_s28, %s1882_s8  }
  0x62   : > { %223 = sbr.rel (%p1965_p8) target bundleno = 876 (0x36c), region = 36  ;;  %s2099_s6 = sand.u32 (!%p1965_p8), 1, %s1858_s16  }
  0x63   : > { %s1265_s21 = sshll.u32 (!%p1965_p8), %s2099_s6, 7  ;;  %s226_s10 = scalar_lea.sflag (!%p1965_p8), [#allocation4], %s2099_s6 }
  0x64   : > { %s2103_s9 = scalar_lea.vmem (!%p1965_p8), [#allocation3], %s1265_s21  ;;  %p2314_p7 = scmp.ne.s32.totalorder (!%p1965_p8), %s2308_s25, 0 }
  0x69   : > { %1841 = dma.done.wait (%p2314_p7), %s226_s10, 2048  }
  0x6a   : > { %1843 = vsyncadd (%p2314_p7), %s226_s10, 4294965248  ;;  %p2315_p2 = scmp.ne.s32.totalorder %s2306_s23, 0 }
  0x6c   : > { %1845 = dma.done.wait (%p2315_p2), [#allocation7], 3072  }
  0x6d   : > { %1847 = vsyncadd (%p2315_p2), [#allocation7], 4294964224  ;;  %v1622_v0 = vld [vmem:[#allocation8] sm:$0xff]   ;;  %v1623_v1 = vld [vmem:[#allocation8 + $0x8] sm:$0xff]   ;;  %s1268_s27 = sshll.u32 %s2099_s6, 6  ;;  %s1349_s13 = sshll.u32 %s1866_s18, 10 }
  0x6e   : > { %1485 = vmatprep.subr.bf16.mxu0 %v1622_v0  ;;  %v1624_v2 = vld [vmem:[#allocation8 + $0x10] sm:$0xff]   ;;  %v1625_v3 = vld [vmem:[#allocation8 + $0x18] sm:$0xff]   ;;  %v1630_v4 = vld [vmem:[#allocation6] sm:$0xff]   ;;  %s2217_s12 = scalar_lea.vmem [#allocation9], %s1268_s27  ;;  %s2245_s24 = scalar_lea.hbm %s2301_s4, %s1349_s13 }
  0x6f   : > { %1486 = vmatpush3.bf16.msra.mxu0 %v1622_v0  ;;  %1501 = vmatprep.mubr.bf16.mxu0 %v1630_v4  ;;  %v1626_v5 = vld [vmem:[#allocation8 + $0x20] sm:$0xff]   ;;  %v1627_v6 = vld [vmem:[#allocation8 + $0x28] sm:$0xff]   ;;  %v1628_v7 = vld [vmem:[#allocation8 + $0x30] sm:$0xff]   ;;  %s1149_s29 = sshll.u32 %s2217_s12, 4  ;;  %s1136_s7 = scalar_lea.sflag [#allocation5], %s2099_s6  ;;  %s2247_s29 = int_to_ptr.vmem [resolvable:$true] %s1149_s29 }
  0x70   : > { %1487 = vmatprep.subr.bf16.mxu0 %v1623_v1  ;;  %v1629_v8 = vld [vmem:[#allocation8 + $0x38] sm:$0xff]   ;;  %v1631_v9 = vld [vmem:[#allocation6 + $0x8] sm:$0xff]   ;;  %v1632_v10 = vld [vmem:[#allocation6 + $0x10] sm:$0xff]   ;;  %s1788_s28 = scalar_lea.vmem %s2247_s29, 1024  ;;  %p2316_p12 = scmp.ne.s32.totalorder %s2312_s30, 0 }
  0x71   : > { %v1633_v11 = vld [vmem:[#allocation6 + $0x18] sm:$0xff]   ;;  %v1634_v12 = vld [vmem:[#allocation6 + $0x20] sm:$0xff]   ;;  %v1635_v13 = vld [vmem:[#allocation6 + $0x28] sm:$0xff]   ;;  %p1789_p8 = scmp.ne.s32.totalorder %s2247_s29, %s1788_s28  ;;  %s1883_s18 = smov [#allocation9]  }
  0x72   : > { %v1636_v14 = vld [vmem:[#allocation6 + $0x30] sm:$0xff]   ;;  %v1637_v15 = vld [vmem:[#allocation6 + $0x38] sm:$0xff]   ;;  %v1638_v16 = vld [vmem:[#allocation6 + $0x40] sm:$0xff]   ;;  %s1792_s8 = sshll.u32 %s1883_s18, 4  ;;  %s1793_s8 = int_to_ptr.vmem [resolvable:$false] %s1792_s8 }
  0x73   : > { %1488 = vmatpush3.bf16.msra.mxu0 %v1623_v1  ;;  %v1639_v17 = vld [vmem:[#allocation6 + $0x48] sm:$0xff]   ;;  %v1640_v18 = vld [vmem:[#allocation6 + $0x50] sm:$0xff]   ;;  %v1641_v19 = vld [vmem:[#allocation6 + $0x58] sm:$0xff]   ;;  %p1790_p1 = pnand %p1789_p8, %p2316_p12  ;;  %s1794_s21 = scalar_lea.vmem %s1793_s8, 2048 }
  0x74   : > { %1489 = vmatprep.subr.bf16.mxu0 %v1624_v2  ;;  %v1642_v20 = vld [vmem:[#allocation6 + $0x60] sm:$0xff]   ;;  %v1643_v21 = vld [vmem:[#allocation6 + $0x68] sm:$0xff]   ;;  %v1644_v22 = vld [vmem:[#allocation6 + $0x70] sm:$0xff]   ;;  %p1795_p3 = scmp.lt.s32.totalorder %s2247_s29, %s1793_s8  ;;  %p1796_p5 = scmp.lt.s32.totalorder %s1794_s21, %s1788_s28 }
  0x75   : > { %v1645_v23 = vld [vmem:[#allocation6 + $0x78] sm:$0xff]   ;;  %v1648_v24 = vld [vmem:[%s2103_s9 + $0x4] ss:$8 sps:$4 sm:$0xff]   ;;  %p1791_p10 = pneg %p1790_p1 }
  0x76   : > { %804 = vmatprep.mubr.bf16.mxu1 %v1648_v24  ;;  %p1797_p9 = por %p1796_p5, %p1795_p3 }
  0x77   : > { %1490 = vmatpush3.bf16.msra.mxu0 %v1624_v2 }
  0x78   : > { %1491 = vmatprep.subr.bf16.mxu0 %v1625_v3  ;;  %p1798_p11 = pnand %p1797_p9, %p1791_p10 }
  0x7b   : > { %1492 = vmatpush3.bf16.msra.mxu0 %v1625_v3 }
  0x7c   : > { %1493 = vmatprep.subr.bf16.mxu0 %v1626_v5 }
  0x7f   : > { %1494 = vmatpush3.bf16.msra.mxu0 %v1626_v5 }
  0x80   : > { %1495 = vmatprep.subr.bf16.mxu0 %v1627_v6 }
  0x83   : > { %1496 = vmatpush3.bf16.msra.mxu0 %v1627_v6 }
  0x84   : > { %1497 = vmatprep.subr.bf16.mxu0 %v1628_v7 }
  0x87   : > { %1498 = vmatpush3.bf16.msra.mxu0 %v1628_v7 }
  0x88   : > { %1499 = vmatprep.subr.bf16.mxu0 %v1629_v8 }
  0x8b   : > { %1500 = vmatpush3.bf16.msra.mxu0 %v1629_v8 }
  0x8e   : > { %1502 = vmatmul.mubr.bf16.vlgmr.msra.gmra.mrb[0].mxu0 %v1631_v9  ;;  %v1646_v9 = vld [vmem:[%s2103_s9] ss:$8 sps:$4 sm:$0xff]  }
  0x8f   : > { %1505 = vmatprep.mubr.bf16.mxu0 %v1632_v10  ;;  %v1649_v10 = vld [vmem:[%s2103_s9 + $0x14] ss:$8 sps:$4 sm:$0xff]  }
  0x96   : > { %1506 = vmatmul.mubr.bf16.gmra.mrb[4].mxu0 %v1633_v11  ;;  %v1651_v11 = vld [vmem:[%s2103_s9 + $0x10] ss:$8 sps:$4 sm:$0xff]  }
  0x97   : > { %1509 = vmatprep.mubr.bf16.mxu0 %v1634_v12  ;;  %v1652_v12 = vld [vmem:[%s2103_s9 + $0x24] ss:$8 sps:$4 sm:$0xff]  }
  0x9e   : > { %1510 = vmatmul.mubr.bf16.gmra.mrb[8].mxu0 %v1635_v13  ;;  %v1654_v13 = vld [vmem:[%s2103_s9 + $0x20] ss:$8 sps:$4 sm:$0xff]  }
  0x9f   : > { %1513 = vmatprep.mubr.bf16.mxu0 %v1636_v14  ;;  %v1655_v14 = vld [vmem:[%s2103_s9 + $0x34] ss:$8 sps:$4 sm:$0xff]  }
  0xa6   : > { %1514 = vmatmul.mubr.bf16.gmra.mrb[12].mxu0 %v1637_v15  ;;  %v1657_v15 = vld [vmem:[%s2103_s9 + $0x30] ss:$8 sps:$4 sm:$0xff]  }
  0xa7   : > { %1517 = vmatprep.mubr.bf16.mxu0 %v1638_v16  ;;  %v1658_v16 = vld [vmem:[%s2103_s9 + $0x44] ss:$8 sps:$4 sm:$0xff]  }
  0xae   : > { %1518 = vmatmul.mubr.bf16.gmra.mrb[16].mxu0 %v1639_v17  ;;  %v1660_v17 = vld [vmem:[%s2103_s9 + $0x40] ss:$8 sps:$4 sm:$0xff]  }
  0xaf   : > { %1521 = vmatprep.mubr.bf16.mxu0 %v1640_v18  ;;  %v1661_v18 = vld [vmem:[%s2103_s9 + $0x54] ss:$8 sps:$4 sm:$0xff]  }
  0xb6   : > { %1522 = vmatmul.mubr.bf16.gmra.mrb[20].mxu0 %v1641_v19  ;;  %v1663_v19 = vld [vmem:[%s2103_s9 + $0x50] ss:$8 sps:$4 sm:$0xff]  }
  0xb7   : > { %1525 = vmatprep.mubr.bf16.mxu0 %v1642_v20  ;;  %v1664_v20 = vld [vmem:[%s2103_s9 + $0x64] ss:$8 sps:$4 sm:$0xff]  }
  0xbe   : > { %1526 = vmatmul.mubr.bf16.gmra.mrb[24].mxu0 %v1643_v21  ;;  %v1666_v21 = vld [vmem:[%s2103_s9 + $0x60] ss:$8 sps:$4 sm:$0xff]  }
  0xbf   : > { %1529 = vmatprep.mubr.bf16.mxu0 %v1644_v22  ;;  %v1667_v22 = vld [vmem:[%s2103_s9 + $0x74] ss:$8 sps:$4 sm:$0xff]  }
  0xc6   : > { %1530 = vmatmul.mubr.bf16.gmra.mrb[28].mxu0 %v1645_v23  ;;  %v1669_v23 = vld [vmem:[%s2103_s9 + $0x70] ss:$8 sps:$4 sm:$0xff]  }
 0x161   : > { %v1503_v25 = vpop.f32.mrb[0].mxu0 }
 0x162   : > { %v517_v26 = vpop.f32.mrb[1].mxu0 }
 0x163   : > { %v1504_v27 = vpop.f32.mrb[2].mxu0 }
 0x164   : > { %v645_v28 = vpack.c.bf16 %v1504_v27, %v1503_v25  ;;  %v520_v29 = vpop.f32.mrb[3].mxu0 }
 0x165   : > { %v644_v30 = vpack.c.bf16 %v520_v29, %v517_v26  ;;  %v2132_v26 = vld [vmem:[%s2300_s3] ss:$0 sm:$0xff] }
 0x169   : > { %v1507_v31 = vpop.f32.mrb[4].mxu0 }
 0x16a   : > { %v533_v32 = vpop.f32.mrb[5].mxu0 }
 0x16b   : > { %v1508_v33 = vpop.f32.mrb[6].mxu0 }
 0x16c   : > { %v647_v34 = vpack.c.bf16 %v1508_v33, %v1507_v31  ;;  %v536_v35 = vpop.f32.mrb[7].mxu0 }
 0x16d   : > { %v646_v36 = vpack.c.bf16 %v536_v35, %v533_v32 }
 0x171   : > { %v1511_v37 = vpop.f32.mrb[8].mxu0 }
 0x172   : > { %v549_v38 = vpop.f32.mrb[9].mxu0 }
 0x173   : > { %v1512_v39 = vpop.f32.mrb[10].mxu0 }
 0x174   : > { %v649_v40 = vpack.c.bf16 %v1512_v39, %v1511_v37  ;;  %v552_v41 = vpop.f32.mrb[11].mxu0 }
 0x175   : > { %v648_v42 = vpack.c.bf16 %v552_v41, %v549_v38 }
 0x179   : > { %v1515_v43 = vpop.f32.mrb[12].mxu0 }
 0x17a   : > { %v565_v44 = vpop.f32.mrb[13].mxu0 }
 0x17b   : > { %v1516_v45 = vpop.f32.mrb[14].mxu0 }
 0x17c   : > { %v651_v46 = vpack.c.bf16 %v1516_v45, %v1515_v43  ;;  %v568_v47 = vpop.f32.mrb[15].mxu0 }
 0x17d   : > { %v650_v48 = vpack.c.bf16 %v568_v47, %v565_v44 }
 0x181   : > { %v1519_v49 = vpop.f32.mrb[16].mxu0 }
 0x182   : > { %v581_v50 = vpop.f32.mrb[17].mxu0 }
 0x183   : > { %v1520_v51 = vpop.f32.mrb[18].mxu0 }
 0x184   : > { %v653_v52 = vpack.c.bf16 %v1520_v51, %v1519_v49  ;;  %v584_v53 = vpop.f32.mrb[19].mxu0 }
 0x185   : > { %v652_v54 = vpack.c.bf16 %v584_v53, %v581_v50 }
 0x187   : > { %1421 = vmatprep.subr.bf16.mxu1 %v652_v54 }
 0x188   : > { %1422 = vmatpush3.bf16.msra.mxu1 %v644_v30 }
 0x189   : > { %v1523_v55 = vpop.f32.mrb[20].mxu0  ;;  %1423 = vmatprep.subr.bf16.mxu1 %v653_v52 }
 0x18a   : > { %v597_v56 = vpop.f32.mrb[21].mxu0 }
 0x18b   : > { %v1524_v57 = vpop.f32.mrb[22].mxu0 }
 0x18c   : > { %v655_v58 = vpack.c.bf16 %v1524_v57, %v1523_v55  ;;  %v600_v59 = vpop.f32.mrb[23].mxu0  ;;  %1424 = vmatpush3.bf16.msra.mxu1 %v645_v28 }
 0x18d   : > { %v654_v60 = vpack.c.bf16 %v600_v59, %v597_v56 }
 0x18f   : > { %1425 = vmatprep.subr.bf16.mxu1 %v654_v60 }
 0x190   : > { %1426 = vmatpush3.bf16.msra.mxu1 %v646_v36 }
 0x191   : > { %v1527_v61 = vpop.f32.mrb[24].mxu0  ;;  %1427 = vmatprep.subr.bf16.mxu1 %v655_v58 }
 0x192   : > { %v613_v62 = vpop.f32.mrb[25].mxu0 }
 0x193   : > { %v1528_v63 = vpop.f32.mrb[26].mxu0 }
 0x194   : > { %v657_v0 = vpack.c.bf16 %v1528_v63, %v1527_v61  ;;  %v616_v1 = vpop.f32.mrb[27].mxu0  ;;  %1428 = vmatpush3.bf16.msra.mxu1 %v647_v34 }
 0x195   : > { %v656_v2 = vpack.c.bf16 %v616_v1, %v613_v62 }
 0x197   : > { %1429 = vmatprep.subr.bf16.mxu1 %v656_v2 }
 0x198   : > { %1430 = vmatpush3.bf16.msra.mxu1 %v648_v42 }
 0x199   : > { %v1531_v3 = vpop.f32.mrb[28].mxu0  ;;  %1431 = vmatprep.subr.bf16.mxu1 %v657_v0 }
 0x19a   : > { %v629_v4 = vpop.f32.mrb[29].mxu0 }
 0x19b   : > { %v1532_v5 = vpop.f32.mrb[30].mxu0 }
 0x19c   : > { %v659_v6 = vpack.c.bf16 %v1532_v5, %v1531_v3  ;;  %v632_v7 = vpop.f32.mrb[31].mxu0  ;;  %1432 = vmatpush3.bf16.msra.mxu1 %v649_v40 }
 0x19d   : > { %v658_v8 = vpack.c.bf16 %v632_v7, %v629_v4 }
 0x19f   : > { %1433 = vmatprep.subr.bf16.mxu1 %v658_v8 }
 0x1a0   : > { %1434 = vmatpush3.bf16.msra.mxu1 %v650_v48 }
 0x1a1   : > { %1435 = vmatprep.subr.bf16.mxu1 %v659_v6 }
 0x1a4   : > { %1436 = vmatpush3.bf16.msra.mxu1 %v651_v46 }
 0x1a7   : > { %805 = vmatmul.mubr.bf16.vlgmr.msra.gmra.mrb[0].mxu1 %v1646_v9 }
 0x1a8   : > { %812 = vmatprep.mubr.bf16.mxu1 %v1649_v10 }
 0x1af   : > { %813 = vmatmul.mubr.bf16.gmra.mrb[4].mxu1 %v1651_v11 }
 0x1b0   : > { %820 = vmatprep.mubr.bf16.mxu1 %v1652_v12 }
 0x1b7   : > { %821 = vmatmul.mubr.bf16.gmra.mrb[8].mxu1 %v1654_v13 }
 0x1b8   : > { %828 = vmatprep.mubr.bf16.mxu1 %v1655_v14 }
 0x1bf   : > { %829 = vmatmul.mubr.bf16.gmra.mrb[12].mxu1 %v1657_v15 }
 0x1c0   : > { %836 = vmatprep.mubr.bf16.mxu1 %v1658_v16 }
 0x1c7   : > { %837 = vmatmul.mubr.bf16.gmra.mrb[16].mxu1 %v1660_v17 }
 0x1c8   : > { %844 = vmatprep.mubr.bf16.mxu1 %v1661_v18 }
 0x1cf   : > { %845 = vmatmul.mubr.bf16.gmra.mrb[20].mxu1 %v1663_v19 }
 0x1d0   : > { %852 = vmatprep.mubr.bf16.mxu1 %v1664_v20 }
 0x1d7   : > { %853 = vmatmul.mubr.bf16.gmra.mrb[24].mxu1 %v1666_v21 }
 0x1d8   : > { %860 = vmatprep.mubr.bf16.mxu1 %v1667_v22 }
 0x1df   : > { %861 = vmatmul.mubr.bf16.gmra.mrb[28].mxu1 %v1669_v23 }
 0x27a   : > { %v1437_v24 = vpop.f32.mrb[0].mxu1 }
 0x27b   : > { %v1438_v25 = vpop.f32.mrb[1].mxu1 }
 0x27c   : > { %v1439_v27 = vadd.f32 %v1438_v25, %v1437_v24  ;;  %v1440_v28 = vpop.f32.mrb[2].mxu1 }
 0x27d   : > { %v1441_v29 = vpop.f32.mrb[3].mxu1 }
 0x27e   : > { %v1442_v30 = vadd.f32 %v1441_v29, %v1440_v28  ;;  %v2135_v31 = vadd.f32 %v1439_v27, %v2132_v26 }
 0x280   : > { %v2138_v32 = vadd.f32 %v1442_v30, %v2132_v26  ;;  %v943_v33 = vmul.f32 %v2135_v31, %v2135_v31 }
 0x282   : > { %v1443_v34 = vpop.f32.mrb[4].mxu1  ;;  %959 = vadd.xlane.f32.xlu0 %v943_v33  ;;  %v944_v38 = vmul.f32 %v2138_v32, %v2138_v32 }
 0x283   : > { %v1444_v35 = vpop.f32.mrb[5].mxu1 }
 0x284   : > { %v1445_v36 = vadd.f32 %v1444_v35, %v1443_v34  ;;  %v1446_v37 = vpop.f32.mrb[6].mxu1 }
 0x285   : > { %v1447_v39 = vpop.f32.mrb[7].mxu1 }
 0x286   : > { %v1448_v40 = vadd.f32 %v1447_v39, %v1446_v37  ;;  %961 = vadd.xlane.f32.xlu0 %v944_v38  ;;  %v2145_v41 = vadd.f32 %v1445_v36, %v2132_v26 }
 0x288   : > { %v2148_v42 = vadd.f32 %v1448_v40, %v2132_v26  ;;  %v945_v43 = vmul.f32 %v2145_v41, %v2145_v41 }
 0x28a   : > { %v1449_v44 = vpop.f32.mrb[8].mxu1  ;;  %963 = vadd.xlane.f32.xlu1 %v945_v43  ;;  %v946_v48 = vmul.f32 %v2148_v42, %v2148_v42 }
 0x28b   : > { %v1450_v45 = vpop.f32.mrb[9].mxu1 }
 0x28c   : > { %v1451_v46 = vadd.f32 %v1450_v45, %v1449_v44  ;;  %v1452_v47 = vpop.f32.mrb[10].mxu1 }
 0x28d   : > { %v1453_v49 = vpop.f32.mrb[11].mxu1 }
 0x28e   : > { %v2155_v50 = vadd.f32 %v1451_v46, %v2132_v26  ;;  %v1454_v51 = vadd.f32 %v1453_v49, %v1452_v47  ;;  %965 = vadd.xlane.f32.xlu1 %v946_v48 }
 0x290   : > { %v2158_v52 = vadd.f32 %v1454_v51, %v2132_v26  ;;  %v947_v53 = vmul.f32 %v2155_v50, %v2155_v50 }
 0x292   : > { %v1455_v54 = vpop.f32.mrb[12].mxu1  ;;  %967 = vadd.xlane.f32.xlu0 %v947_v53  ;;  %v948_v55 = vmul.f32 %v2158_v52, %v2158_v52 }
 0x293   : > { %v1456_v56 = vpop.f32.mrb[13].mxu1 }
 0x294   : > { %v1457_v57 = vadd.f32 %v1456_v56, %v1455_v54  ;;  %v1458_v58 = vpop.f32.mrb[14].mxu1  ;;  %969 = vadd.xlane.f32.xlu1 %v948_v55 }
 0x295   : > { %v1459_v59 = vpop.f32.mrb[15].mxu1 }
 0x296   : > { %v2165_v60 = vadd.f32 %v1457_v57, %v2132_v26  ;;  %v1460_v61 = vadd.f32 %v1459_v59, %v1458_v58 }
 0x298   : > { %v2168_v62 = vadd.f32 %v1460_v61, %v2132_v26  ;;  %v949_v63 = vmul.f32 %v2165_v60, %v2165_v60 }
 0x29a   : > { %v1461_v0 = vpop.f32.mrb[16].mxu1  ;;  %971 = vadd.xlane.f32.xlu0 %v949_v63  ;;  %v950_v1 = vmul.f32 %v2168_v62, %v2168_v62 }
 0x29b   : > { %v1462_v2 = vpop.f32.mrb[17].mxu1 }
 0x29c   : > { %v1463_v3 = vadd.f32 %v1462_v2, %v1461_v0  ;;  %v1464_v4 = vpop.f32.mrb[18].mxu1  ;;  %973 = vadd.xlane.f32.xlu1 %v950_v1 }
 0x29d   : > { %v1465_v5 = vpop.f32.mrb[19].mxu1 }
 0x29e   : > { %v2175_v6 = vadd.f32 %v1463_v3, %v2132_v26  ;;  %v1466_v7 = vadd.f32 %v1465_v5, %v1464_v4 }
 0x2a0   : > { %v2178_v8 = vadd.f32 %v1466_v7, %v2132_v26  ;;  %v951_v9 = vmul.f32 %v2175_v6, %v2175_v6 }
 0x2a2   : > { %v1467_v10 = vpop.f32.mrb[20].mxu1  ;;  %975 = vadd.xlane.f32.xlu0 %v951_v9  ;;  %v952_v11 = vmul.f32 %v2178_v8, %v2178_v8 }
 0x2a3   : > { %v1468_v12 = vpop.f32.mrb[21].mxu1 }
 0x2a4   : > { %v1469_v13 = vadd.f32 %v1468_v12, %v1467_v10  ;;  %v1470_v14 = vpop.f32.mrb[22].mxu1  ;;  %977 = vadd.xlane.f32.xlu1 %v952_v11 }
 0x2a5   : > { %v1471_v15 = vpop.f32.mrb[23].mxu1 }
 0x2a6   : > { %v2185_v16 = vadd.f32 %v1469_v13, %v2132_v26  ;;  %v1472_v17 = vadd.f32 %v1471_v15, %v1470_v14 }
 0x2a8   : > { %v2188_v18 = vadd.f32 %v1472_v17, %v2132_v26  ;;  %v953_v19 = vmul.f32 %v2185_v16, %v2185_v16 }
 0x2aa   : > { %v1473_v20 = vpop.f32.mrb[24].mxu1  ;;  %979 = vadd.xlane.f32.xlu0 %v953_v19  ;;  %v954_v21 = vmul.f32 %v2188_v18, %v2188_v18 }
 0x2ab   : > { %v1474_v22 = vpop.f32.mrb[25].mxu1 }
 0x2ac   : > { %v1475_v23 = vadd.f32 %v1474_v22, %v1473_v20  ;;  %v1476_v24 = vpop.f32.mrb[26].mxu1  ;;  %981 = vadd.xlane.f32.xlu1 %v954_v21 }
 0x2ad   : > { %v1477_v25 = vpop.f32.mrb[27].mxu1 }
 0x2ae   : > { %v2195_v27 = vadd.f32 %v1475_v23, %v2132_v26  ;;  %v1478_v28 = vadd.f32 %v1477_v25, %v1476_v24 }
 0x2b0   : > { %v2198_v29 = vadd.f32 %v1478_v28, %v2132_v26  ;;  %v955_v30 = vmul.f32 %v2195_v27, %v2195_v27 }
 0x2b2   : > { %v1479_v33 = vpop.f32.mrb[28].mxu1  ;;  %983 = vadd.xlane.f32.xlu0 %v955_v30  ;;  %v956_v34 = vmul.f32 %v2198_v29, %v2198_v29 }
 0x2b3   : > { %v1480_v35 = vpop.f32.mrb[29].mxu1 }
 0x2b4   : > { %v1481_v36 = vadd.f32 %v1480_v35, %v1479_v33  ;;  %v1482_v37 = vpop.f32.mrb[30].mxu1  ;;  %985 = vadd.xlane.f32.xlu1 %v956_v34 }
 0x2b5   : > { %v1483_v38 = vpop.f32.mrb[31].mxu1 }
 0x2b6   : > { %v2205_v39 = vadd.f32 %v1481_v36, %v2132_v26  ;;  %v1484_v40 = vadd.f32 %v1483_v38, %v1482_v37 }
 0x2b8   : > { %v2208_v43 = vadd.f32 %v1484_v40, %v2132_v26  ;;  %v957_v44 = vmul.f32 %v2205_v39, %v2205_v39 }
 0x2ba   : > { %987 = vadd.xlane.f32.xlu0 %v957_v44  ;;  %v958_v45 = vmul.f32 %v2208_v43, %v2208_v43 }
 0x2bc   : > { %989 = vadd.xlane.f32.xlu1 %v958_v45 }
 0x30f   : > { %v960_v46 = vpop.xlane.xlu0 %959 }
 0x310   : > { %v991_v47 = vmax.f32 %v960_v46, 1e-24 }
 0x312   : > { %1670 = vrsqrt.f32 %v991_v47 }
 0x313   : > { %v962_v48 = vpop.xlane.xlu0 %961 }
 0x314   : > { %v992_v49 = vmax.f32 %v962_v48, 1e-24 }
 0x316   : > { %1672 = vrsqrt.f32 %v992_v49 }
 0x317   : > { %v964_v51 = vpop.xlane.xlu1 %963 }
 0x318   : > { %v993_v53 = vmax.f32 %v964_v51, 1e-24 }
 0x31a   : > { %1674 = vrsqrt.f32 %v993_v53 }
 0x31b   : > { %v966_v26 = vpop.xlane.xlu1 %965 }
 0x31c   : > { %v1671_v54 = vpop.eup %1670  ;;  %v994_v55 = vmax.f32 %v966_v26, 1e-24 }
 0x31d   : > { %v1023_v56 = vmul.f32 %v1671_v54, %v2135_v31 }
 0x31e   : > { %1676 = vrsqrt.f32 %v994_v55 }
 0x31f   : > { %v968_v57 = vpop.xlane.xlu0 %967  ;;  %v1039_v1 = vmax.f32 %v1023_v56, 0.0 }
 0x320   : > { %v1673_v58 = vpop.eup %1672  ;;  %v995_v59 = vmax.f32 %v968_v57, 1e-24 }
 0x321   : > { %v1024_v61 = vmul.f32 %v1673_v58, %v2138_v32  ;;  %v970_v63 = vpop.xlane.xlu1 %969 }
 0x322   : > { %1678 = vrsqrt.f32 %v995_v59  ;;  %v996_v0 = vmax.f32 %v970_v63, 1e-24 }
 0x323   : > { %v1040_v2 = vmax.f32 %v1024_v61, 0.0 }
 0x324   : > { %v1675_v3 = vpop.eup %1674  ;;  %1680 = vrsqrt.f32 %v996_v0 }
 0x325   : > { %v1353_v4 = vpack.c.bf16 %v1040_v2, %v1039_v1  ;;  %v1025_v31 = vmul.f32 %v1675_v3, %v2145_v41 }
 0x327   : > { %1354 = vst [vmem:[%s2217_s12] sm:$0xff] %v1353_v4   ;;  %v972_v5 = vpop.xlane.xlu0 %971  ;;  %v1041_v12 = vmax.f32 %v1025_v31, 0.0 }
 0x328   : > { %v1677_v7 = vpop.eup %1676  ;;  %v997_v9 = vmax.f32 %v972_v5, 1e-24 }
 0x329   : > { %v1026_v32 = vmul.f32 %v1677_v7, %v2148_v42  ;;  %v974_v10 = vpop.xlane.xlu1 %973 }
 0x32a   : > { %1682 = vrsqrt.f32 %v997_v9  ;;  %v998_v11 = vmax.f32 %v974_v10, 1e-24 }
 0x32b   : > { %v1042_v13 = vmax.f32 %v1026_v32, 0.0 }
 0x32c   : > { %v1679_v14 = vpop.eup %1678  ;;  %1684 = vrsqrt.f32 %v998_v11 }
 0x32d   : > { %v1358_v15 = vpack.c.bf16 %v1042_v13, %v1041_v12  ;;  %v1027_v17 = vmul.f32 %v1679_v14, %v2155_v50 }
 0x32e   : > { %v1681_v19 = vpop.eup %1680 }
 0x32f   : > { %1390 = vst [vmem:[%s2217_s12 + $0x8] sm:$0xff] %v1358_v15   ;;  %v1028_v41 = vmul.f32 %v1681_v19, %v2158_v52  ;;  %v976_v20 = vpop.xlane.xlu0 %975  ;;  %v1043_v22 = vmax.f32 %v1027_v17, 0.0 }
 0x330   : > { %v999_v21 = vmax.f32 %v976_v20, 1e-24 }
 0x331   : > { %v1044_v23 = vmax.f32 %v1028_v41, 0.0  ;;  %v978_v42 = vpop.xlane.xlu1 %977 }
 0x332   : > { %1686 = vrsqrt.f32 %v999_v21  ;;  %v1000_v24 = vmax.f32 %v978_v42, 1e-24 }
 0x333   : > { %v1363_v25 = vpack.c.bf16 %v1044_v23, %v1043_v22 }
 0x334   : > { %v1683_v28 = vpop.eup %1682  ;;  %1688 = vrsqrt.f32 %v1000_v24 }
 0x335   : > { %1391 = vst [vmem:[%s2217_s12 + $0x10] sm:$0xff] %v1363_v25   ;;  %v1029_v30 = vmul.f32 %v1683_v28, %v2165_v60 }
 0x336   : > { %v1685_v33 = vpop.eup %1684 }
 0x337   : > { %v1030_v50 = vmul.f32 %v1685_v33, %v2168_v62  ;;  %v980_v34 = vpop.xlane.xlu0 %979  ;;  %v1045_v52 = vmax.f32 %v1029_v30, 0.0 }
 0x338   : > { %v1001_v35 = vmax.f32 %v980_v34, 1e-24 }
 0x339   : > { %v1046_v36 = vmax.f32 %v1030_v50, 0.0  ;;  %v982_v37 = vpop.xlane.xlu1 %981 }
 0x33a   : > { %1690 = vrsqrt.f32 %v1001_v35  ;;  %v1002_v38 = vmax.f32 %v982_v37, 1e-24 }
 0x33b   : > { %v1368_v40 = vpack.c.bf16 %v1046_v36, %v1045_v52 }
 0x33c   : > { %v1687_v44 = vpop.eup %1686  ;;  %1692 = vrsqrt.f32 %v1002_v38 }
 0x33d   : > { %1392 = vst [vmem:[%s2217_s12 + $0x18] sm:$0xff] %v1368_v40   ;;  %v1031_v45 = vmul.f32 %v1687_v44, %v2175_v6 }
 0x33e   : > { %v1689_v46 = vpop.eup %1688 }
 0x33f   : > { %v1032_v60 = vmul.f32 %v1689_v46, %v2178_v8  ;;  %v984_v47 = vpop.xlane.xlu0 %983  ;;  %v1047_v62 = vmax.f32 %v1031_v45, 0.0 }
 0x340   : > { %v1003_v48 = vmax.f32 %v984_v47, 1e-24 }
 0x341   : > { %v1048_v49 = vmax.f32 %v1032_v60, 0.0  ;;  %v986_v51 = vpop.xlane.xlu1 %985 }
 0x342   : > { %1694 = vrsqrt.f32 %v1003_v48  ;;  %v1004_v53 = vmax.f32 %v986_v51, 1e-24 }
 0x343   : > { %v1373_v26 = vpack.c.bf16 %v1048_v49, %v1047_v62 }
 0x344   : > { %v1691_v54 = vpop.eup %1690  ;;  %1696 = vrsqrt.f32 %v1004_v53 }
 0x345   : > { %1393 = vst [vmem:[%s2217_s12 + $0x20] sm:$0xff] %v1373_v26   ;;  %v1033_v55 = vmul.f32 %v1691_v54, %v2185_v16 }
 0x346   : > { %v1693_v56 = vpop.eup %1692 }
 0x347   : > { %v1034_v6 = vmul.f32 %v1693_v56, %v2188_v18  ;;  %v988_v57 = vpop.xlane.xlu0 %987  ;;  %v1049_v8 = vmax.f32 %v1033_v55, 0.0 }
 0x348   : > { %v1005_v58 = vmax.f32 %v988_v57, 1e-24 }
 0x349   : > { %v1050_v59 = vmax.f32 %v1034_v6, 0.0  ;;  %v990_v61 = vpop.xlane.xlu1 %989 }
 0x34a   : > { %1698 = vrsqrt.f32 %v1005_v58  ;;  %v1006_v63 = vmax.f32 %v990_v61, 1e-24 }
 0x34b   : > { %v1378_v0 = vpack.c.bf16 %v1050_v59, %v1049_v8 }
 0x34c   : > { %v1695_v1 = vpop.eup %1694  ;;  %1700 = vrsqrt.f32 %v1006_v63 }
 0x34d   : > { %1394 = vst [vmem:[%s2217_s12 + $0x28] sm:$0xff] %v1378_v0   ;;  %v1035_v2 = vmul.f32 %v1695_v1, %v2195_v27 }
 0x34e   : > { %v1697_v16 = vpop.eup %1696 }
 0x34f   : > { %v1036_v3 = vmul.f32 %v1697_v16, %v2198_v29  ;;  %v1051_v18 = vmax.f32 %v1035_v2, 0.0 }
 0x351   : > { %v1052_v4 = vmax.f32 %v1036_v3, 0.0 }
 0x353   : > { %v1383_v31 = vpack.c.bf16 %v1052_v4, %v1051_v18 }
 0x354   : > { %v1699_v5 = vpop.eup %1698 }
 0x355   : > { %1395 = vst [vmem:[%s2217_s12 + $0x30] sm:$0xff] %v1383_v31   ;;  %v1037_v7 = vmul.f32 %v1699_v5, %v2205_v39 }
 0x356   : > { %v1701_v9 = vpop.eup %1700 }
 0x357   : > { %v1038_v32 = vmul.f32 %v1701_v9, %v2208_v43  ;;  %v1053_v10 = vmax.f32 %v1037_v7, 0.0 }
 0x359   : > { %v1054_v27 = vmax.f32 %v1038_v32, 0.0 }
 0x35b   : > { %v1388_v29 = vpack.c.bf16 %v1054_v27, %v1053_v10 }
 0x35d   : > { %1396 = vst [vmem:[%s2217_s12 + $0x38] sm:$0xff] %v1388_v29  }
 0x35e   : > { %1801 = shalt.err (!%p1798_p11)
}
 0x35f   : > { %s1802_s10 = scalar_lea.hbm %s2245_s24, 1024  ;;  %s1806_s25 = scalar_lea.hbm %s2301_s4, 2048 }
 0x360   : > { %p1803_p0 = scmp.ne.s32.totalorder %s2245_s24, %s1802_s10  ;;  %p1807_p6 = scmp.lt.u32.totalorder %s2245_s24, %s2301_s4 }
 0x361   : > { %p1808_p7 = scmp.lt.u32.totalorder %s1806_s25, %s1802_s10  ;;  %p1810_p8 = scmp.lt.u32.totalorder %s1802_s10, %s2245_s24 }
 0x362   : > { %p1804_p4 = pnand %p1803_p0, %p2316_p12 }
 0x363   : > { %p1809_p2 = por %p1808_p7, %p1807_p6 }
 0x364   : > { %p1805_p13 = pneg %p1804_p4 }
 0x365   : > { %p1811_p1 = por %p1810_p8, %p1809_p2 }
 0x367   : > { %p1812_p10 = pnand %p1811_p1, %p1805_p13 }
 0x369   : > { %1815 = shalt.err (!%p1812_p10)
}
 0x36a   : > { %s1884_s13 = smov 64   ;;  %s1885_s14 = smov 4  }
 0x36b   : > { %1543 = dma.vmem_to_hbm [thread:$0]  (%p2316_p12), %s2247_s29, 1024, %s2245_s24, %s1136_s7, %s1884_s13, %s1884_s13, %s1885_s14  }
 0x36c PF: > { %s1164_s11 = sand.u32 1, %s1854_s15   ;;  %p2317_p3 = scmp.ne.s32.totalorder %s2309_s26, 0 }
 0x36d   : > { %p2318_p5 = scmp.ge.s32.totalorder %s1874_s20, 2  ;;  %s1165_s28 = scalar_lea.sflag [#allocation5], %s1164_s11 }
 0x36f   : > { %p1557_p9 = pnand %p2318_p5, %p2317_p3 }
 0x371   : > { %1849 = dma.done.wait (!%p1557_p9), %s1165_s28, 1024  }
 0x372   : > { %1851 = vsyncadd (!%p1557_p9), %s1165_s28, 4294966272  ;;  %s21_s20 = sadd.s32 1, %s1874_s20   ;;  %s2319_s15 = smov %s1858_s16 }
 0x373   : > { %p18_p11 = scmp.ge.s32.totalorder %s21_s20, 4   ;;  %s2320_s16 = smov %s1862_s17 }
 0x374   : > { %s2321_s17 = smov %s2053_s22  ;;  %s2322_s18 = smov %s1870_s19 }
 0x375   : > { %s2323_s19 = smov %s2325_s5  ;;  %20 = sbr.rel (!%p18_p11) target bundleno = 7 (0x7), region = 98 }
 0x37c   :  { %1170 = vsyncpa [#allocation4], 1 }
 0x37d   :  { %1172 = vsyncpa [#allocation4 + $0x1], 1 }
 0x37e   :  { %1173 = vsyncpa [#allocation7], 1 }
 0x37f   :  { %1174 = vsyncpa [#allocation5], 1 }
 0x380   :  { %1176 = vsyncpa [#allocation5 + $0x1], 1 }

</bundles_post_ra>
